<compile_context>
chip_gen: v7x
topology: tpu7x:2x2x1
jax: 0.10.0
libtpu: 0.0.40
codegen_flags: <defaults>
</compile_context>

<pallas_src>
import functools

import jax
import jax.numpy as jnp
from jax import lax
from jax.experimental import pallas as pl
from jax.experimental.pallas import tpu as pltpu

EPS = 1e-5  # PyTorch nn.LayerNorm default


def _round_up(a, b):
    return (a + b - 1) // b * b


def _block_spec(shape, index_map, n_buffers=None):
    """BlockSpec with an optional buffer-count override (safe fallback)."""
    if n_buffers is None:
        return pl.BlockSpec(shape, index_map)
    try:
        return pl.BlockSpec(shape, index_map, pipeline_mode=pl.Buffered(n_buffers))
    except (TypeError, AttributeError):
        # Older JAX without pipeline_mode / Buffered: fall back to default.
        return pl.BlockSpec(shape, index_map)


def prenorm_kernel(x_ref, w_ref, b_ref, o_ref, xn_ref, *, d_orig, d_is_padded):
    """One (row-tile, col-tile) grid step.

    x_ref : (TR, Dp)  input rows (original dtype)
    w_ref : (Dp, tn)  folded weight W' = gamma[:,None] * W^T   (bf16)
    b_ref : (1,  tn)  folded bias  b' = beta @ W^T + bias      (f32)
    o_ref : (TR, tn)  output tile
    xn_ref: (TR, Dp)  VMEM scratch holding the normalized rows (bf16),
                      written once per row tile at n == 0.
    """
    # LayerNorm once per row tile; reused across all output-column steps.
    @pl.when(pl.program_id(1) == 0)
    def _():
        x = x_ref[...].astype(jnp.float32)
        inv_d = 1.0 / d_orig
        mean = jnp.sum(x, axis=-1, keepdims=True) * inv_d
        cent = x - mean
        if d_is_padded:
            # Padded feature lanes hold zeros in x, but centering makes them
            # -mean; mask them so the two-pass variance stays exact.
            lane = lax.broadcasted_iota(jnp.int32, x.shape, 1)
            cent = jnp.where(lane < d_orig, cent, 0.0)
        var = jnp.sum(cent * cent, axis=-1, keepdims=True) * inv_d
        xn_ref[...] = (cent * lax.rsqrt(var + EPS)).astype(xn_ref.dtype)

    # fn = Linear: xn @ (gamma*W^T) + (beta@W^T + bias). bf16 MXU, f32 accum.
    out = jnp.dot(xn_ref[...], w_ref[...], preferred_element_type=jnp.float32)
    o_ref[...] = (out + b_ref[...]).astype(o_ref.dtype)


def prenorm(x, gamma, beta, w_t, w_bias, *, tile_rows=256, col_tile=512,
            mxu_dtype=jnp.bfloat16, out_dtype=None):
    """PreNorm with fn = Linear.

    x: (B, N, D). gamma/beta: (D,) LayerNorm affine. w_t: (D, D) = W^T (so the
    linear is y @ w_t + w_bias). w_bias: (D,).
    """
    B, N, D = x.shape
    out_dtype = x.dtype if out_dtype is None else out_dtype
    R = B * N

    # ---- tiling ------------------------------------------------------------
    Dp = _round_up(max(D, 128), 128)                       # lane-dense features
    tile_rows = max(8, _round_up(min(tile_rows, _round_up(R, 8)), 8))
    Rp = _round_up(R, tile_rows)                           # minimal row padding
    tn = max(128, _round_up(min(col_tile, Dp), 128))
    while Dp % tn != 0:                                    # tn must divide Dp
        tn -= 128
    n_tiles = Dp // tn
    # Grid-invariant weight/bias (single column tile) -> single-buffer them.
    w_buffers = 1 if n_tiles == 1 else None

    # ---- fold LayerNorm affine into the Linear (wrapper-side, once) ---------
    gamma_f = gamma.astype(jnp.float32)
    beta_f = beta.astype(jnp.float32)
    w_f = w_t.astype(jnp.float32)
    w_eff = gamma_f[:, None] * w_f                          # (D, D) f32
    b_eff = beta_f @ w_f + w_bias.astype(jnp.float32)       # (D,)  f32

    # ---- padding (skipped entirely when shapes already conform) -------------
    xf = x.reshape(R, D)
    if Rp != R or Dp != D:
        xf = jnp.pad(xf, ((0, Rp - R), (0, Dp - D)))
    if Dp != D:
        w_eff = jnp.pad(w_eff, ((0, Dp - D), (0, Dp - D)))
        b_eff = jnp.pad(b_eff, (0, Dp - D))
    w_p = w_eff.astype(mxu_dtype)
    b_p = b_eff.reshape(1, Dp)

    # ---- VMEM budget: size from actual buffers, never the whole chip --------
    x_item = jnp.dtype(x.dtype).itemsize
    o_item = jnp.dtype(out_dtype).itemsize
    w_item = jnp.dtype(mxu_dtype).itemsize
    w_bufs = 1 if n_tiles == 1 else 2
    needed = (2 * tile_rows * Dp * x_item        # x tile, double-buffered
              + 2 * tile_rows * tn * o_item      # out tile, double-buffered
              + w_bufs * Dp * tn * w_item        # W' tile(s)
              + w_bufs * 8 * tn * 4              # bias tile(s), sublane-padded
              + tile_rows * Dp * w_item)         # xn scratch
    vmem_limit = int(min(max(needed + 2 * 1024 * 1024, 8 * 1024 * 1024),
                         48 * 1024 * 1024))

    kernel = functools.partial(prenorm_kernel, d_orig=D, d_is_padded=(Dp != D))
    out = pl.pallas_call(
        kernel,
        out_shape=jax.ShapeDtypeStruct((Rp, Dp), out_dtype),
        grid_spec=pltpu.PrefetchScalarGridSpec(
            num_scalar_prefetch=0,
            grid=(Rp // tile_rows, n_tiles),
            in_specs=[
                # x rows: invariant along n (not re-fetched across col steps)
                pl.BlockSpec((tile_rows, Dp), lambda i, n: (i, 0)),
                # folded weight W' (bf16), column-tiled
                _block_spec((Dp, tn), lambda i, n: (0, n), w_buffers),
                # folded bias b' (f32), column-tiled
                _block_spec((1, tn), lambda i, n: (0, n), w_buffers),
            ],
            out_specs=pl.BlockSpec((tile_rows, tn), lambda i, n: (i, n)),
            scratch_shapes=[pltpu.VMEM((tile_rows, Dp), mxu_dtype)],
        ),
        compiler_params=pltpu.CompilerParams(
            dimension_semantics=("parallel", "arbitrary"),
            vmem_limit_bytes=vmem_limit),
    )(xf, w_p, b_p)

    if Rp != R or Dp != D:
        out = out[:R, :D]
    return out.reshape(B, N, D)


def prenorm_ref_bf16(x, gamma, beta, w_t, w_bias, *, mxu_dtype=jnp.bfloat16):
    """Reference matching the kernel's numerics (bf16 MXU operands, folded affine)."""
    xf = x.astype(jnp.float32)
    mean = jnp.mean(xf, axis=-1, keepdims=True)
    var = jnp.mean((xf - mean) ** 2, axis=-1, keepdims=True)
    xn = (xf - mean) * lax.rsqrt(var + EPS)
    w_eff = (gamma.astype(jnp.float32)[:, None]
             * w_t.astype(jnp.float32)).astype(mxu_dtype)
    b_eff = beta.astype(jnp.float32) @ w_t.astype(jnp.float32) \
        + w_bias.astype(jnp.float32)
    out = jnp.dot(xn.astype(mxu_dtype), w_eff,
                  preferred_element_type=jnp.float32) + b_eff
    return out.astype(x.dtype)


def prenorm_ref_f32(x, gamma, beta, w_t, w_bias):
    """Pure-f32 PyTorch-semantics reference: Linear(LayerNorm(x))."""
    xf = x.astype(jnp.float32)
    mean = jnp.mean(xf, axis=-1, keepdims=True)
    var = jnp.mean((xf - mean) ** 2, axis=-1, keepdims=True)
    y = (xf - mean) / jnp.sqrt(var + EPS) * gamma + beta
    return (y @ w_t + w_bias).astype(x.dtype)


if __name__ == "__main__":
    B, N, D = 2, 8, 32

    key = jax.random.PRNGKey(0)
    kx, kw, kb = jax.random.split(key, 3)

    x = jax.random.normal(kx, (B, N, D), dtype=jnp.float32)

    # LayerNorm params (PyTorch init: weight=1, bias=0)
    gamma = jnp.ones((D,), jnp.float32)
    beta = jnp.zeros((D,), jnp.float32)

    # fn = Linear(D, D): deterministic uniform init like torch (bound = 1/sqrt(D))
    bound = 1.0 / (D ** 0.5)
    w = jax.random.uniform(kw, (D, D), jnp.float32, -bound, bound)   # (out, in)
    w_bias = jax.random.uniform(kb, (D,), jnp.float32, -bound, bound)
    w_t = w.T  # kernel consumes W^T so it can do y @ W^T directly

    out = jax.block_until_ready(prenorm(x, gamma, beta, w_t, w_bias))
    assert out.shape == (B, N, D)
    assert bool(jnp.all(jnp.isfinite(out)))

    # Tight check against a reference with the same bf16-operand MXU path.
    ref_b = prenorm_ref_bf16(x, gamma, beta, w_t, w_bias)
    assert jnp.allclose(out, ref_b, atol=2e-2, rtol=2e-2)

    # Semantics check against the pure-f32 PyTorch forward (looser tolerance:
    # the kernel feeds bf16 operands to the MXU).
    ref_f = prenorm_ref_f32(x, gamma, beta, w_t, w_bias)
    assert jnp.allclose(out, ref_f, atol=6e-2, rtol=6e-2)

    print("KERNEL_OK")
</pallas_src>

<mosaic_0001>
module attributes {stable_mosaic.version = 11 : i64} {
  func.func @prenorm_kernel(%arg0: i32, %arg1: i32, %arg2: memref<16x128xf32, #tpu.memory_space<vmem>>, %arg3: memref<128x128xbf16, #tpu.memory_space<vmem>>, %arg4: memref<1x128xf32, #tpu.memory_space<vmem>>, %arg5: memref<16x128xf32, #tpu.memory_space<vmem>>, %arg6: memref<16x128xbf16, #tpu.memory_space<vmem>>) attributes {dimension_semantics = [#tpu.dimension_semantics<parallel>, #tpu.dimension_semantics<arbitrary>], iteration_bounds = array<i64: 1, 1>, scalar_prefetch = 0 : i64, scratch_operands = 1 : i64, tpu.core_type = #tpu.core_type<tc>, window_params = [{transform_indices = @transform_0, window_bounds = array<i64: 16, 128>}, {pipeline_mode = #tpu.pipeline_mode<synchronous>, transform_indices = @transform_1, window_bounds = array<i64: 128, 128>}, {pipeline_mode = #tpu.pipeline_mode<synchronous>, transform_indices = @transform_2, window_bounds = array<i64: 1, 128>}, {transform_indices = @transform_3, window_bounds = array<i64: 16, 128>}]} {
    %c0_i32 = arith.constant 0 : i32
    %0 = arith.cmpi eq, %arg1, %c0_i32 : i32
    %1 = arith.extui %0 : i1 to i32
    %c0_i32_0 = arith.constant 0 : i32
    %2 = arith.cmpi ne, %1, %c0_i32_0 : i32
    scf.if %2 {
      %c0_8 = arith.constant 0 : index
      %c0_9 = arith.constant 0 : index
      %10 = vector.load %arg2[%c0_8, %c0_9] : memref<16x128xf32, #tpu.memory_space<vmem>>, vector<16x128xf32>
      %cst_10 = arith.constant dense<0.000000e+00> : vector<16xf32>
      %11 = vector.multi_reduction <add>, %10, %cst_10 [1] : vector<16x128xf32> to vector<16xf32>
      %12 = vector.shape_cast %11 : vector<16xf32> to vector<16x1xf32>
      %cst_11 = arith.constant 3.125000e-02 : f32
      %13 = vector.broadcast %cst_11 : f32 to vector<16x1xf32>
      %14 = arith.mulf %12, %13 : vector<16x1xf32>
      %15 = vector.broadcast %14 : vector<16x1xf32> to vector<16x128xf32>
      %16 = arith.subf %10, %15 : vector<16x128xf32>
      %17 = tpu.iota {dimensions = array<i32: 1>} : vector<16x128xi32>
      %c32_i32 = arith.constant 32 : i32
      %18 = vector.broadcast %c32_i32 : i32 to vector<16x128xi32>
      %19 = arith.cmpi slt, %17, %18 : vector<16x128xi32>
      %cst_12 = arith.constant 0.000000e+00 : f32
      %20 = vector.broadcast %cst_12 : f32 to vector<16x128xf32>
      %21 = arith.select %19, %16, %20 : vector<16x128xi1>, vector<16x128xf32>
      %22 = arith.mulf %21, %21 : vector<16x128xf32>
      %cst_13 = arith.constant dense<0.000000e+00> : vector<16xf32>
      %23 = vector.multi_reduction <add>, %22, %cst_13 [1] : vector<16x128xf32> to vector<16xf32>
      %24 = vector.shape_cast %23 : vector<16xf32> to vector<16x1xf32>
      %cst_14 = arith.constant 3.125000e-02 : f32
      %25 = vector.broadcast %cst_14 : f32 to vector<16x1xf32>
      %26 = arith.mulf %24, %25 : vector<16x1xf32>
      %cst_15 = arith.constant 9.99999974E-6 : f32
      %27 = vector.broadcast %cst_15 : f32 to vector<16x1xf32>
      %28 = arith.addf %26, %27 : vector<16x1xf32>
      %29 = math.rsqrt %28 : vector<16x1xf32>
      %30 = vector.broadcast %29 : vector<16x1xf32> to vector<16x128xf32>
      %31 = arith.mulf %21, %30 : vector<16x128xf32>
      %32 = arith.truncf %31 : vector<16x128xf32> to vector<16x128xbf16>
      %c0_16 = arith.constant 0 : index
      %c0_17 = arith.constant 0 : index
      %33 = vector.load %arg6[%c0_16, %c0_17] : memref<16x128xbf16, #tpu.memory_space<vmem>>, vector<16x128xbf16>
      tpu.vector_store %arg6[%c0_16, %c0_17], %32 {strides = array<i32>} : memref<16x128xbf16, #tpu.memory_space<vmem>>, vector<16x128xbf16>,
    } else {
    }
    %c0 = arith.constant 0 : index
    %c0_1 = arith.constant 0 : index
    %3 = vector.load %arg6[%c0, %c0_1] : memref<16x128xbf16, #tpu.memory_space<vmem>>, vector<16x128xbf16>
    %c0_2 = arith.constant 0 : index
    %c0_3 = arith.constant 0 : index
    %4 = vector.load %arg3[%c0_2, %c0_3] : memref<128x128xbf16, #tpu.memory_space<vmem>>, vector<128x128xbf16>
    %cst = arith.constant dense<0.000000e+00> : vector<16x128xf32>
    %5 = tpu.matmul %3, %4, %cst {dimension_numbers = #tpu.dot_dimension_numbers<[1], [0], [0], [1], [0, 0, 1, 1], [], []>} : vector<16x128xbf16>, vector<128x128xbf16>, vector<16x128xf32> -> vector<16x128xf32>
    %c0_4 = arith.constant 0 : index
    %c0_5 = arith.constant 0 : index
    %6 = vector.load %arg4[%c0_4, %c0_5] : memref<1x128xf32, #tpu.memory_space<vmem>>, vector<1x128xf32>
    %7 = vector.broadcast %6 : vector<1x128xf32> to vector<16x128xf32>
    %8 = arith.addf %5, %7 : vector<16x128xf32>
    %c0_6 = arith.constant 0 : index
    %c0_7 = arith.constant 0 : index
    %9 = vector.load %arg5[%c0_6, %c0_7] : memref<16x128xf32, #tpu.memory_space<vmem>>, vector<16x128xf32>
    tpu.vector_store %arg5[%c0_6, %c0_7], %8 {strides = array<i32>} : memref<16x128xf32, #tpu.memory_space<vmem>>, vector<16x128xf32>,
    return
  }
  func.func @transform_0(%arg0: i32, %arg1: i32) -> (i32, i32) {
    %c0_i32 = arith.constant 0 : i32
    %c0_i32_0 = arith.constant 0 : i32
    return %arg0, %c0_i32 : i32, i32
  }
  func.func @transform_1(%arg0: i32, %arg1: i32) -> (i32, i32) {
    %c0_i32 = arith.constant 0 : i32
    %c0_i32_0 = arith.constant 0 : i32
    return %c0_i32, %arg1 : i32, i32
  }
  func.func @transform_2(%arg0: i32, %arg1: i32) -> (i32, i32) {
    %c0_i32 = arith.constant 0 : i32
    %c0_i32_0 = arith.constant 0 : i32
    return %c0_i32, %arg1 : i32, i32
  }
  func.func @transform_3(%arg0: i32, %arg1: i32) -> (i32, i32) {
    %c0_i32 = arith.constant 0 : i32
    return %arg0, %arg1 : i32, i32
  }
}

</mosaic_0001>

<bundles_post_ra>
// kernel: tpu_custom_call.1
= control target key start
LH: loop header
LB: loop body
LE: loop exit
PB: predicated region body
PF: predicated region fallthrough
CT: control target
= control target key end

     0   :  { %8 = vsyncpa [#allocation4], 0  ;;  %s417_s0 = inlined_call_operand.hbm [shape: f32[16,128], index: 0, kind: input, shape index: {}]   ;;  %s418_s1 = inlined_call_operand.hbm [shape: bf16[128,128], index: 1, kind: input, shape index: {}]   ;;  %s419_s2 = inlined_call_operand.vmem [shape: f32[1,128], index: 2, kind: input, shape index: {}]   ;;  %s420_s3 = inlined_call_operand.hbm [shape: f32[16,128], index: 3, kind: output, shape index: {}]  }
   0x1   :  { %9 = vsyncpa [#allocation7], 0 }
   0x2   :  { %10 = vsyncpa [#allocation5], 0  ;;  %s343_s12 = smov [#allocation3]   ;;  %s271_s16 = scalar_lea.hbm %s417_s0, 256 }
   0x3   :  { %s16_s13 = sshll.u32 %s343_s12, 4  ;;  %p272_p0 = scmp.ne.s32.totalorder %s417_s0, %s271_s16  ;;  %s17_s13 = int_to_ptr.vmem [resolvable:$true] %s16_s13 }
   0x4   :  { %p275_p1 = scmp.lt.u32.totalorder %s271_s16, %s417_s0 }
   0x6   :  { %p277_p2 = pnand %p275_p1, %p272_p0 }
   0x8   :  { %280 = shalt.err (!%p277_p2)
}
   0x9   :  { %s281_s21 = scalar_lea.vmem %s17_s13, 256  ;;  %p286_p4 = scmp.lt.s32.totalorder %s17_s13, %s17_s13 }
   0xa   :  { %p282_p3 = scmp.ne.s32.totalorder %s17_s13, %s281_s21  ;;  %p287_p5 = scmp.lt.s32.totalorder %s281_s21, %s281_s21 }
   0xc   :  { %p288_p6 = por %p287_p5, %p286_p4 }
   0xe   :  { %p289_p7 = pnand %p288_p6, %p282_p3 }
  0x10   :  { %292 = shalt.err (!%p289_p7)
}
  0x11   :  { %s344_s22 = smov 128   ;;  %s345_s23 = smov 8  }
  0x12   :  { %22 = dma.hbm_to_vmem [thread:$0]  %s417_s0, 256, %s17_s13, [#allocation4], %s344_s22, %s344_s22, %s345_s23  }
  0x13   :  { %s346_s26 = smov [#allocation6]   ;;  %s293_s30 = scalar_lea.hbm %s418_s1, 1024 }
  0x14   :  { %s28_s27 = sshll.u32 %s346_s26, 4  ;;  %p294_p8 = scmp.ne.s32.totalorder %s418_s1, %s293_s30  ;;  %s29_s27 = int_to_ptr.vmem [resolvable:$true] %s28_s27 }
  0x15   :  { %p297_p9 = scmp.lt.u32.totalorder %s293_s30, %s418_s1 }
  0x17   :  { %p299_p10 = pnand %p297_p9, %p294_p8 }
  0x19   :  { %302 = shalt.err (!%p299_p10)
}
  0x1a   :  { %s303_s8 = scalar_lea.vmem %s29_s27, 1024  ;;  %p308_p12 = scmp.lt.s32.totalorder %s29_s27, %s29_s27 }
  0x1b   :  { %p304_p11 = scmp.ne.s32.totalorder %s29_s27, %s303_s8  ;;  %p309_p13 = scmp.lt.s32.totalorder %s303_s8, %s303_s8 }
  0x1d   :  { %p310_p0 = por %p309_p13, %p308_p12 }
  0x1f   :  { %p311_p1 = pnand %p310_p0, %p304_p11 }
  0x21   :  { %314 = shalt.err (!%p311_p1)
}
  0x22   :  { %s347_s0 = smov 64   ;;  %s348_s9 = smov 4  }
  0x23   :  { %34 = dma.hbm_to_vmem [thread:$0]  %s418_s1, 1024, %s29_s27, [#allocation7], %s347_s0, %s347_s0, %s348_s9  }
  0x24   :  { %337 = dma.done.wait [#allocation4], 256  }
  0x25   :  { %338 = vsyncadd [#allocation4], 4294967040 }
  0x26   :  { %339 = dma.done.wait [#allocation7], 1024  }
  0x27   :  { %340 = vsyncadd [#allocation7], 4294966272  ;;  %v48_v0 = vld [vmem:[#allocation3] sm:$0xff]  ;;  %v49_v1 = vld [vmem:[#allocation3 + $0x8] sm:$0xff]  ;;  %v349_v3 = vmov 0.0   ;;  %v58_v5 = vlaneseq  ;;  %vm350_vm1 = vmmov 0  }
  0x28   :  { %50 = vadd.xlane.f32.xlu0 %v48_v0  ;;  %v259_v2 = vld [vmem:[#allocation6] sm:$0xff]   ;;  %230 = vmatprep.subr.bf16.mxu0 %v349_v3  ;;  %v260_v4 = vld [vmem:[#allocation6 + $0x8] sm:$0xff]   ;;  %v261_v17 = vld [vmem:[#allocation6 + $0x10] sm:$0xff]   ;;  %s351_s13 = smov [#allocation8]  }
  0x29   :  { %231 = vmatpush3.bf16.msra.mxu0 %v259_v2  ;;  %v59_v6 = vand.u32 127, %v58_v5  ;;  %v262_v18 = vld [vmem:[#allocation6 + $0x18] sm:$0xff]   ;;  %v263_v19 = vld [vmem:[#allocation6 + $0x20] sm:$0xff]   ;;  %v264_v20 = vld [vmem:[#allocation6 + $0x28] sm:$0xff]   ;;  %246 = vmatprep.mubr.msk.bf16.mxu0 %vm350_vm1, %v349_v3  ;;  %s199_s14 = sshll.u32 %s351_s13, 4  ;;  %s200_s14 = int_to_ptr.vmem [resolvable:$true] %s199_s14 }
  0x2a   :  { %232 = vmatprep.subr.bf16.mxu0 %v349_v3  ;;  %v265_v21 = vld [vmem:[#allocation6 + $0x30] sm:$0xff]   ;;  %v266_v22 = vld [vmem:[#allocation6 + $0x38] sm:$0xff]   ;;  %s315_s15 = scalar_lea.vmem %s200_s14, 256  ;;  %p320_p3 = scmp.lt.s32.totalorder %s200_s14, %s200_s14 }
  0x2b   :  { %vm60_vm0 = vcmp.lt.s32.totalorder %v59_v6, 32  ;;  %v212_v34 = vld [vmem:[%s419_s2] ss:$0 sm:$0xff]  ;;  %p316_p2 = scmp.ne.s32.totalorder %s200_s14, %s315_s15  ;;  %p321_p4 = scmp.lt.s32.totalorder %s315_s15, %s315_s15 }
  0x2c   :  { %52 = vadd.xlane.f32.xlu0 %v49_v1 }
  0x2d   :  { %233 = vmatpush3.bf16.msra.mxu0 %v260_v4  ;;  %p322_p5 = por %p321_p4, %p320_p3 }
  0x2e   :  { %234 = vmatprep.subr.bf16.mxu0 %v349_v3 }
  0x2f   :  { %p323_p6 = pnand %p322_p5, %p316_p2 }
  0x31   :  { %235 = vmatpush3.bf16.msra.mxu0 %v261_v17 }
  0x32   :  { %236 = vmatprep.subr.bf16.mxu0 %v349_v3 }
  0x35   :  { %237 = vmatpush3.bf16.msra.mxu0 %v262_v18 }
  0x36   :  { %238 = vmatprep.subr.bf16.mxu0 %v349_v3 }
  0x39   :  { %239 = vmatpush3.bf16.msra.mxu0 %v263_v19 }
  0x3a   :  { %240 = vmatprep.subr.bf16.mxu0 %v349_v3 }
  0x3d   :  { %241 = vmatpush3.bf16.msra.mxu0 %v264_v20 }
  0x3e   :  { %242 = vmatprep.subr.bf16.mxu0 %v349_v3 }
  0x41   :  { %243 = vmatpush3.bf16.msra.mxu0 %v265_v21 }
  0x42   :  { %244 = vmatprep.subr.bf16.mxu0 %v349_v3 }
  0x45   :  { %245 = vmatpush3.bf16.msra.mxu0 %v266_v22 }
  0xb5   :  { %v51_v7 = vpop.xlane.xlu0 %50 }
  0xb6   :  { %v54_v8 = vmul.f32 0.03125, %v51_v7 }
  0xb8   :  { %v56_v9 = vsub.f32 %v48_v0, %v54_v8 }
  0xb9   :  { %v53_v10 = vpop.xlane.xlu0 %52 }
  0xba   :  { %v55_v11 = vmul.f32 0.03125, %v53_v10  ;;  %v61_v12 = vsel %vm60_vm0, %v56_v9, 0.0 }
  0xbb   :  { %v63_v13 = vmul.f32 %v61_v12, %v61_v12 }
  0xbc   :  { %v57_v14 = vsub.f32 %v49_v1, %v55_v11 }
  0xbd   :  { %65 = vadd.xlane.f32.xlu1 %v63_v13 }
  0xbe   :  { %v62_v15 = vsel %vm60_vm0, %v57_v14, 0.0 }
  0xbf   :  { %v64_v16 = vmul.f32 %v62_v15, %v62_v15 }
  0xc1   :  { %67 = vadd.xlane.f32.xlu1 %v64_v16 }
 0x14a   :  { %v66_v23 = vpop.xlane.xlu1 %65 }
 0x14b   :  { %v69_v24 = vmul.f32 0.03125, %v66_v23 }
 0x14d   :  { %v71_v25 = vadd.f32 1e-05, %v69_v24 }
 0x14e   :  { %v68_v26 = vpop.xlane.xlu1 %67 }
 0x14f   :  { %v70_v27 = vmul.f32 0.03125, %v68_v26  ;;  %267 = vrsqrt.f32 %v71_v25 }
 0x151   :  { %v72_v28 = vadd.f32 1e-05, %v70_v27 }
 0x153   :  { %269 = vrsqrt.f32 %v72_v28 }
 0x159   :  { %v268_v29 = vpop.eup %267 }
 0x15a   :  { %v75_v31 = vmul.f32 %v268_v29, %v61_v12 }
 0x15d   :  { %v270_v30 = vpop.eup %269 }
 0x15e   :  { %v76_v32 = vmul.f32 %v270_v30, %v62_v15 }
 0x160   :  { %v77_v33 = vpack.c.bf16 %v76_v32, %v75_v31 }
 0x162   :  { %247 = vmatmul.mubr.bf16.vlgmr.msra.gmra.mrb[0].mxu0 %v77_v33 }
 0x235   :  { %v185_v35 = vpop.f32.mrb[0].mxu0 }
 0x236   :  { %v186_v36 = vadd.f32 %v212_v34, %v185_v35  ;;  %v248_v37 = vpop.f32.mrb[1].mxu0 }
 0x237   :  { %v188_v38 = vpop.f32.mrb[2].mxu0 }
 0x238   :  { %192 = vst [vmem:[#allocation8] sm:$0xff] %v186_v36  ;;  %v189_v39 = vadd.f32 %v212_v34, %v188_v38  ;;  %v249_v40 = vpop.f32.mrb[3].mxu0 }
 0x23a   :  { %193 = vst [vmem:[#allocation8 + $0x8] sm:$0xff] %v189_v39 }
 0x23b   :  { %326 = shalt.err (!%p323_p6)
}
 0x23c   :  { %s327_s17 = scalar_lea.hbm %s420_s3, 256 }
 0x23d   :  { %p328_p7 = scmp.ne.s32.totalorder %s420_s3, %s327_s17  ;;  %p331_p8 = scmp.lt.u32.totalorder %s327_s17, %s420_s3 }
 0x23f   :  { %p333_p9 = pnand %p331_p8, %p328_p7 }
 0x241   :  { %336 = shalt.err (!%p333_p9)
}
 0x242   :  { %205 = dma.vmem_to_hbm [thread:$0]  %s200_s14, 256, %s420_s3, [#allocation5], %s344_s22, %s344_s22, %s345_s23  }
 0x243   :  { %341 = dma.done.wait [#allocation5], 256  }
 0x244   :  { %342 = vsyncadd [#allocation5], 4294967040 }
 0x245   :  { %209 = vsyncpa [#allocation4], 1 }
 0x246   :  { %210 = vsyncpa [#allocation7], 1 }
 0x247   :  { %211 = vsyncpa [#allocation5], 1 }

</bundles_post_ra>
